<compile_context>
chip_gen: v6e
topology: v6e:2x2x1
jax: 0.10.0
libtpu: 0.0.40
codegen_flags: <defaults>
</compile_context>

<pallas_src>
import functools

import jax
import jax.numpy as jnp
from jax import lax
from jax.experimental import pallas as pl
from jax.experimental.pallas import tpu as pltpu

GAMMA = 2.0            # module default; implemented as an explicit square below
LABEL_SMOOTHING = 0.1


def _focal_loss_kernel(logits_ref, targets_ref, out_ref, *, n_total, inv_n):
    i = pl.program_id(0)

    # Init the resident (1,1) accumulator block on the first grid step.
    @pl.when(i == 0)
    def _init():
        out_ref[...] = jnp.zeros_like(out_ref)

    logits = logits_ref[...].astype(jnp.float32)          # (tile_n, C)
    targets = targets_ref[...]                            # (tile_n, 1) int32
    tn, c = logits.shape

    # Mask rows past the true N (only emitted when the last tile is padded).
    needs_mask = (n_total % tn) != 0
    if needs_mask:
        row_ids = i * tn + lax.broadcasted_iota(jnp.int32, (tn, 1), 0)
        row_valid = row_ids < n_total                      # (tile_n, 1) bool
        # Zero padded rows *before* any math so garbage/NaN never propagates.
        logits = jnp.where(row_valid, logits, 0.0)

    # Numerically stable log-sum-exp pieces (no full (tile_n, C) logp tensor).
    m = jnp.max(logits, axis=-1, keepdims=True)            # (tile_n, 1)
    shifted = logits - m
    lse = jnp.log(jnp.sum(jnp.exp(shifted), axis=-1, keepdims=True))

    # Smoothed CE without materializing onehot / q / logp:
    #   ce = -[(1-eps) * (shifted[target] - lse) + (eps/C) * (sum_c shifted - C*lse)]
    class_ids = lax.broadcasted_iota(jnp.int32, (tn, c), 1)
    shifted_at_t = jnp.sum(
        jnp.where(class_ids == targets, shifted, 0.0), axis=-1, keepdims=True)
    sum_shifted = jnp.sum(shifted, axis=-1, keepdims=True)

    ce = -((1.0 - LABEL_SMOOTHING) * (shifted_at_t - lse)
           + (LABEL_SMOOTHING / c) * (sum_shifted - c * lse))   # (tile_n, 1)

    # Focal reweighting; gamma == 2 -> explicit square (no pow -> no log/exp).
    pt = jnp.exp(-ce)
    one_m_pt = 1.0 - pt
    focal = one_m_pt * one_m_pt * ce                        # (tile_n, 1)

    if needs_mask:
        focal = jnp.where(row_valid, focal, 0.0)

    out_ref[...] = out_ref[...] + jnp.sum(focal, axis=(0, 1), keepdims=True)

    # Finalize the mean on the last step.
    @pl.when(i == pl.num_programs(0) - 1)
    def _finalize():
        out_ref[...] = out_ref[...] * inv_n


def _choose_tile_n(n, c, itemsize):
    # Target ~4 MiB per logits block: with double-buffering plus the small
    # targets block this stays far below the 32 MiB scoped-VMEM default (and
    # v7x's 64 MiB physical VMEM) while keeping each DMA large enough to
    # approach the HBM roofline.
    rows = (4 * 1024 * 1024) // max(c * itemsize, 1)
    rows = max(8, min(1024, rows))
    rows = (rows // 8) * 8                                  # (8,128) tiling rule
    if n <= rows:
        return n                                            # full-dim block is always legal
    return rows


def focal_loss(logits, targets, *, tile_n=None):
    """logits: (N, C) float (f32 or bf16); targets: (N,) int class indices.

    Returns the scalar focal loss (gamma=2.0, label_smoothing=0.1, mean)."""
    n, c = logits.shape
    itemsize = jnp.dtype(logits.dtype).itemsize
    targets2d = targets.astype(jnp.int32).reshape(n, 1)

    if tile_n is None:
        tile_n = _choose_tile_n(n, c, itemsize)
    tile_n = min(tile_n, n)
    num_tiles = pl.cdiv(n, tile_n)

    kernel = functools.partial(_focal_loss_kernel, n_total=n, inv_n=1.0 / n)

    cost = pl.CostEstimate(
        flops=6 * n * c,                          # shifts, selects, reductions, focal
        transcendentals=n * c + 3 * n,            # exp per element + log/exp per row
        bytes_accessed=n * c * itemsize + n * 4 + 4,
    )

    out = pl.pallas_call(
        kernel,
        out_shape=jax.ShapeDtypeStruct((1, 1), jnp.float32),
        grid=(num_tiles,),
        in_specs=[
            pl.BlockSpec((tile_n, c), lambda i: (i, 0)),     # logits tile
            pl.BlockSpec((tile_n, 1), lambda i: (i, 0)),     # targets tile
        ],
        # Constant index map -> output block stays resident across the whole
        # reduction grid and is written back to HBM exactly once.
        out_specs=pl.BlockSpec((1, 1), lambda i: (0, 0)),
        compiler_params=pltpu.CompilerParams(
            dimension_semantics=("arbitrary",),              # sequential reduction axis
            vmem_limit_bytes=32 * 1024 * 1024,
        ),
        cost_estimate=cost,
    )(logits, targets2d)
    # TODO(synk): for v7x megacore, emit per-tile partials on a "parallel" axis
    # and finish the mean in the wrapper to use both TensorCores.
    return out[0, 0]


def _reference_focal_loss(logits, targets):
    # Pure-JAX reference mirroring F.cross_entropy(label_smoothing=0.1) + focal.
    n, c = logits.shape
    logp = jax.nn.log_softmax(logits.astype(jnp.float32), axis=-1)
    onehot = jax.nn.one_hot(targets, c, dtype=jnp.float32)
    q = (1.0 - LABEL_SMOOTHING) * onehot + LABEL_SMOOTHING / c
    ce = -jnp.sum(q * logp, axis=-1)
    pt = jnp.exp(-ce)
    return jnp.mean(((1.0 - pt) ** GAMMA) * ce)


if __name__ == "__main__":
    key = jax.random.PRNGKey(0)
    k1, k2, k3, k4 = jax.random.split(key, 4)

    # Small shapes consistent with the module's usage: (batch, num_classes).
    batch, num_classes = 8, 4
    logits = jax.random.normal(k1, (batch, num_classes), dtype=jnp.float32)
    targets = jax.random.randint(k2, (batch,), 0, num_classes, dtype=jnp.int32)

    loss = focal_loss(logits, targets)
    jax.block_until_ready(loss)
    ref = _reference_focal_loss(logits, targets)
    assert jnp.allclose(loss, ref, atol=1e-5, rtol=1e-5), (loss, ref)

    # Second check exercising the multi-tile accumulation path with a padded
    # final tile (100 rows, tile of 32 -> 4 grid steps, last one masked).
    n2, c2 = 100, 12
    logits2 = jax.random.normal(k3, (n2, c2), dtype=jnp.float32)
    targets2 = jax.random.randint(k4, (n2,), 0, c2, dtype=jnp.int32)
    loss2 = focal_loss(logits2, targets2, tile_n=32)
    jax.block_until_ready(loss2)
    ref2 = _reference_focal_loss(logits2, targets2)
    assert jnp.allclose(loss2, ref2, atol=1e-5, rtol=1e-5), (loss2, ref2)

    print("KERNEL_OK")
</pallas_src>

<mosaic_0001>
module attributes {stable_mosaic.version = 11 : i64} {
  func.func @_focal_loss_kernel(%arg0: i32, %arg1: memref<8x4xf32, #tpu.memory_space<vmem>>, %arg2: memref<8x1xi32, #tpu.memory_space<vmem>>, %arg3: memref<1x1xf32, #tpu.memory_space<vmem>>) attributes {dimension_semantics = [#tpu.dimension_semantics<arbitrary>], iteration_bounds = array<i64: 1>, scalar_prefetch = 0 : i64, scratch_operands = 0 : i64, tpu.core_type = #tpu.core_type<tc>, window_params = [{transform_indices = @transform_0, window_bounds = array<i64: 8, 4>}, {transform_indices = @transform_1, window_bounds = array<i64: 8, 1>}, {pipeline_mode = #tpu.pipeline_mode<synchronous>, transform_indices = @transform_2, window_bounds = array<i64: 1, 1>}]} {
    %c0_i32 = arith.constant 0 : i32
    %0 = arith.cmpi eq, %arg0, %c0_i32 : i32
    %1 = arith.extui %0 : i1 to i32
    %c0_i32_0 = arith.constant 0 : i32
    %2 = arith.cmpi ne, %1, %c0_i32_0 : i32
    scf.if %2 {
      %cst_21 = arith.constant 0.000000e+00 : f32
      %51 = vector.broadcast %cst_21 : f32 to vector<1x1xf32>
      %c0_22 = arith.constant 0 : index
      %c0_23 = arith.constant 0 : index
      %52 = vector.load %arg3[%c0_22, %c0_23] : memref<1x1xf32, #tpu.memory_space<vmem>>, vector<1x1xf32>
      tpu.vector_store %arg3[%c0_22, %c0_23], %51 {strides = array<i32>} : memref<1x1xf32, #tpu.memory_space<vmem>>, vector<1x1xf32>,
    } else {
    }
    %c0 = arith.constant 0 : index
    %c0_1 = arith.constant 0 : index
    %3 = vector.load %arg1[%c0, %c0_1] : memref<8x4xf32, #tpu.memory_space<vmem>>, vector<8x4xf32>
    %c0_2 = arith.constant 0 : index
    %c0_3 = arith.constant 0 : index
    %4 = vector.load %arg2[%c0_2, %c0_3] : memref<8x1xi32, #tpu.memory_space<vmem>>, vector<8x1xi32>
    %cst = arith.constant dense<0xFF800000> : vector<8xf32>
    %5 = vector.multi_reduction <maximumf>, %3, %cst [1] : vector<8x4xf32> to vector<8xf32>
    %6 = vector.shape_cast %5 : vector<8xf32> to vector<8x1xf32>
    %7 = vector.broadcast %6 : vector<8x1xf32> to vector<8x4xf32>
    %8 = arith.subf %3, %7 : vector<8x4xf32>
    %9 = math.exp %8 : vector<8x4xf32>
    %cst_4 = arith.constant dense<0.000000e+00> : vector<8xf32>
    %10 = vector.multi_reduction <add>, %9, %cst_4 [1] : vector<8x4xf32> to vector<8xf32>
    %11 = vector.shape_cast %10 : vector<8xf32> to vector<8x1xf32>
    %12 = math.log %11 : vector<8x1xf32>
    %13 = tpu.iota {dimensions = array<i32: 1>} : vector<8x4xi32>
    %14 = vector.broadcast %4 : vector<8x1xi32> to vector<8x4xi32>
    %15 = arith.cmpi eq, %13, %14 : vector<8x4xi32>
    %cst_5 = arith.constant 0.000000e+00 : f32
    %16 = vector.broadcast %cst_5 : f32 to vector<8x4xf32>
    %17 = arith.select %15, %8, %16 : vector<8x4xi1>, vector<8x4xf32>
    %cst_6 = arith.constant dense<0.000000e+00> : vector<8xf32>
    %18 = vector.multi_reduction <add>, %17, %cst_6 [1] : vector<8x4xf32> to vector<8xf32>
    %19 = vector.shape_cast %18 : vector<8xf32> to vector<8x1xf32>
    %cst_7 = arith.constant dense<0.000000e+00> : vector<8xf32>
    %20 = vector.multi_reduction <add>, %8, %cst_7 [1] : vector<8x4xf32> to vector<8xf32>
    %21 = vector.shape_cast %20 : vector<8xf32> to vector<8x1xf32>
    %22 = arith.subf %19, %12 : vector<8x1xf32>
    %cst_8 = arith.constant 0.899999976 : f32
    %23 = vector.broadcast %cst_8 : f32 to vector<8x1xf32>
    %24 = arith.mulf %23, %22 : vector<8x1xf32>
    %cst_9 = arith.constant 4.000000e+00 : f32
    %25 = vector.broadcast %cst_9 : f32 to vector<8x1xf32>
    %26 = arith.mulf %25, %12 : vector<8x1xf32>
    %27 = arith.subf %21, %26 : vector<8x1xf32>
    %cst_10 = arith.constant 2.500000e-02 : f32
    %28 = vector.broadcast %cst_10 : f32 to vector<8x1xf32>
    %29 = arith.mulf %28, %27 : vector<8x1xf32>
    %30 = arith.addf %24, %29 : vector<8x1xf32>
    %cst_11 = arith.constant 0.000000e+00 : f32
    %31 = vector.broadcast %cst_11 : f32 to vector<8x1xf32>
    %32 = arith.subf %31, %30 : vector<8x1xf32>
    %cst_12 = arith.constant 0.000000e+00 : f32
    %33 = vector.broadcast %cst_12 : f32 to vector<8x1xf32>
    %34 = arith.subf %33, %32 : vector<8x1xf32>
    %35 = math.exp %34 : vector<8x1xf32>
    %cst_13 = arith.constant 1.000000e+00 : f32
    %36 = vector.broadcast %cst_13 : f32 to vector<8x1xf32>
    %37 = arith.subf %36, %35 : vector<8x1xf32>
    %38 = arith.mulf %37, %37 : vector<8x1xf32>
    %39 = arith.mulf %38, %32 : vector<8x1xf32>
    %c0_14 = arith.constant 0 : index
    %c0_15 = arith.constant 0 : index
    %40 = vector.load %arg3[%c0_14, %c0_15] : memref<1x1xf32, #tpu.memory_space<vmem>>, vector<1x1xf32>
    %41 = vector.shape_cast %39 : vector<8x1xf32> to vector<1x8x1xf32>
    %cst_16 = arith.constant dense<0.000000e+00> : vector<1xf32>
    %42 = vector.multi_reduction <add>, %41, %cst_16 [1, 2] : vector<1x8x1xf32> to vector<1xf32>
    %43 = vector.shape_cast %42 : vector<1xf32> to vector<1x1x1xf32>
    %44 = vector.extract %43[0, 0, 0] : f32 from vector<1x1x1xf32>
    %45 = vector.broadcast %44 : f32 to vector<1x1xf32>
    %46 = arith.addf %40, %45 : vector<1x1xf32>
    %c0_17 = arith.constant 0 : index
    %c0_18 = arith.constant 0 : index
    %47 = vector.load %arg3[%c0_17, %c0_18] : memref<1x1xf32, #tpu.memory_space<vmem>>, vector<1x1xf32>
    tpu.vector_store %arg3[%c0_17, %c0_18], %46 {strides = array<i32>} : memref<1x1xf32, #tpu.memory_space<vmem>>, vector<1x1xf32>,
    %c0_i32_19 = arith.constant 0 : i32
    %48 = arith.cmpi eq, %arg0, %c0_i32_19 : i32
    %49 = arith.extui %48 : i1 to i32
    %c0_i32_20 = arith.constant 0 : i32
    %50 = arith.cmpi ne, %49, %c0_i32_20 : i32
    scf.if %50 {
      %c0_21 = arith.constant 0 : index
      %c0_22 = arith.constant 0 : index
      %51 = vector.load %arg3[%c0_21, %c0_22] : memref<1x1xf32, #tpu.memory_space<vmem>>, vector<1x1xf32>
      %cst_23 = arith.constant 1.250000e-01 : f32
      %52 = vector.broadcast %cst_23 : f32 to vector<1x1xf32>
      %53 = arith.mulf %51, %52 : vector<1x1xf32>
      %c0_24 = arith.constant 0 : index
      %c0_25 = arith.constant 0 : index
      %54 = vector.load %arg3[%c0_24, %c0_25] : memref<1x1xf32, #tpu.memory_space<vmem>>, vector<1x1xf32>
      tpu.vector_store %arg3[%c0_24, %c0_25], %53 {strides = array<i32>} : memref<1x1xf32, #tpu.memory_space<vmem>>, vector<1x1xf32>,
    } else {
    }
    return
  }
  func.func @transform_0(%arg0: i32) -> (i32, i32) {
    %c0_i32 = arith.constant 0 : i32
    %c0_i32_0 = arith.constant 0 : i32
    return %arg0, %c0_i32 : i32, i32
  }
  func.func @transform_1(%arg0: i32) -> (i32, i32) {
    %c0_i32 = arith.constant 0 : i32
    %c0_i32_0 = arith.constant 0 : i32
    return %arg0, %c0_i32 : i32, i32
  }
  func.func @transform_2(%arg0: i32) -> (i32, i32) {
    %c0_i32 = arith.constant 0 : i32
    %c0_i32_0 = arith.constant 0 : i32
    %c0_i32_1 = arith.constant 0 : i32
    return %c0_i32, %c0_i32_0 : i32, i32
  }
}

</mosaic_0001>

<bundles_post_ra>
// kernel: tpu_custom_call.1
= control target key start
LH: loop header
LB: loop body
LE: loop exit
PB: predicated region body
PF: predicated region fallthrough
CT: control target
= control target key end

     0   :  { %vm20_vm0 = vcmask 31744   ;;  %s162_s0 = inlined_call_operand.vmem [shape: f32[8,4], index: 0, kind: input, shape index: {}]   ;;  %s163_s1 = inlined_call_operand.vmem [shape: s32[8,1], index: 1, kind: input, shape index: {}]   ;;  %s164_s2 = inlined_call_operand.hbm [shape: f32[1,1], index: 2, kind: output, shape index: {}]  }
   0x1   :  { %v18_v0 = vld [vmem:[%s162_s0] sm:$0xff] }
   0x2   :  { %7 = vsyncpa [#allocation3], 0  ;;  %v21_v1 = vsel %vm20_vm0, %v18_v0, -inf  ;;  %v128_v2 = vmov 0   ;;  %v19_v3 = vld [vmem:[%s163_s1] sm:$0xff]  ;;  %v32_v7 = vlaneseq  ;;  %vm59_vm2 = vcmask 7168  }
   0x3   :  { %99 = vset.pattern.permute.xlu0 %v128_v2  ;;  %vm16_vm3 = vcmask 0   ;;  %v129_v34 = vmov 0.0   ;;  %s130_s1 = smov [#allocation2]  }
   0x4   :  { %22 = vmax.xlane.f32.xlu0 %v21_v1  ;;  %v33_v8 = vand.u32 127, %v32_v7  ;;  %17 = vst.msk [vmem:[#allocation2] sm:$0x1] %vm16_vm3, %v129_v34  ;;  %s86_s13 = sshll.u32 %s130_s1, 4  ;;  %s87_s13 = int_to_ptr.vmem [resolvable:$true] %s86_s13 }
   0x5   :  { %s106_s14 = scalar_lea.vmem %s87_s13, 16  ;;  %s110_s15 = scalar_lea.vmem %s87_s13, 32 }
   0x6   :  { %p107_p0 = scmp.ne.s32.totalorder %s87_s13, %s106_s14  ;;  %p111_p1 = scmp.lt.s32.totalorder %s87_s13, %s87_s13 }
   0x7   :  { %p112_p2 = scmp.lt.s32.totalorder %s110_s15, %s106_s14 }
   0x9   :  { %p113_p3 = por %p112_p2, %p111_p1 }
   0xb   :  { %v58_v42 = vld [vmem:[#allocation2] sm:$0x1]  ;;  %p114_p4 = pnand %p113_p3, %p107_p0 }
  0x1a   :  { %35 = vperm.xlu0 %99, %v19_v3  }
  0x8d   :  { %v23_v4 = vpop.xlane.xlu0 %22 }
  0x8e   :  { %v24_v5 = vsub.f32 %v18_v0, %v23_v4 }
  0x90   :  { %v25_v6 = vmul.f32 1.442695, %v24_v5  ;;  %v42_v14 = vsel %vm20_vm0, %v24_v5, 0.0 }
  0x92   :  { %100 = vpow2.f32 %v25_v6 }
  0x95   :  { %v36_v9 = vpop.permute.xlu0 %35 }
  0x96   :  { %vm37_vm1 = vcmp.eq.s32.totalorder %v33_v8, %v36_v9 }
  0x97   :  { %v38_v12 = vsel %vm37_vm1, %v24_v5, 0.0 }
  0x98   :  { %v39_v13 = vsel %vm20_vm0, %v38_v12, 0.0 }
  0x9f   :  { %v101_v10 = vpop.eup %100 }
  0xa0   :  { %v27_v11 = vsel %vm20_vm0, %v101_v10, 0.0 }
  0xa1   :  { %28 = vadd.xlane.f32.xlu1 %v27_v11 }
  0xa5   :  { %40 = vadd.xlane.f32.xlu1 %v39_v13 }
  0xa9   :  { %43 = vadd.xlane.f32.xlu1 %v42_v14 }
 0x12a   :  { %v29_v15 = vpop.xlane.xlu1 %28 }
 0x12b   :  { %102 = vlog2.f32 %v29_v15 }
 0x12e   :  { %v41_v16 = vpop.xlane.xlu1 %40 }
 0x132   :  { %v44_v21 = vpop.xlane.xlu1 %43 }
 0x138   :  { %v103_v17 = vpop.eup %102 }
 0x139   :  { %v31_v18 = vmul.f32 0.6931472, %v103_v17 }
 0x13b   :  { %v45_v19 = vsub.f32 %v41_v16, %v31_v18  ;;  %v47_v20 = vmul.f32 4.0, %v31_v18 }
 0x13d   :  { %v48_v22 = vsub.f32 %v44_v21, %v47_v20  ;;  %v46_v23 = vmul.f32 0.9, %v45_v19 }
 0x13f   :  { %v49_v24 = vmul.f32 0.025, %v48_v22 }
 0x141   :  { %v50_v25 = vadd.f32 %v49_v24, %v46_v23 }
 0x143   :  { %v51_v26 = vsub.f32 0.0, %v50_v25 }
 0x145   :  { %v52_v27 = vsub.f32 0.0, %v51_v26 }
 0x147   :  { %v53_v28 = vmul.f32 1.442695, %v52_v27 }
 0x149   :  { %104 = vpow2.f32 %v53_v28 }
 0x156   :  { %v105_v29 = vpop.eup %104 }
 0x157   :  { %v55_v30 = vsub.f32 1.0, %v105_v29 }
 0x159   :  { %v56_v31 = vmul.f32 %v55_v30, %v55_v30 }
 0x15b   :  { %v57_v32 = vmul.f32 %v56_v31, %v51_v26 }
 0x15d   :  { %v60_v33 = vsel %vm59_vm2, %v57_v32, 0.0 }
 0x15e   :  { %61 = vadd.xlane.f32.xlu1 %v60_v33 }
 0x1e7   :  { %v62_v35 = vpop.xlane.xlu1 %61 }
 0x1e8   :  { %v63_v36 = vrot.slane %v62_v35, 4 }
 0x1ea   :  { %v64_v37 = vadd.f32 %v63_v36, %v62_v35 }
 0x1ec   :  { %v65_v38 = vrot.slane %v64_v37, 2 }
 0x1ee   :  { %v66_v39 = vadd.f32 %v65_v38, %v64_v37 }
 0x1f0   :  { %v67_v40 = vrot.slane %v66_v39, 1 }
 0x1f2   :  { %v68_v41 = vadd.f32 %v67_v40, %v66_v39 }
 0x1f4   :  { %94 = vpush %v68_v41 }
 0x225   :  { %s95_s0 = spop %94 }
 0x226   :  { %v70_v43 = vstv %s95_s0 }
 0x227   :  { %v71_v44 = vadd.f32 %v70_v43, %v58_v42 }
 0x229   :  { %73 = vst.msk [vmem:[#allocation2] sm:$0x1] %vm16_vm3, %v71_v44 }
 0x230   :  { %v77_v45 = vld [vmem:[#allocation2] sm:$0x1] }
 0x231   :  { %v78_v46 = vmul.f32 0.125, %v77_v45 }
 0x233   :  { %79 = vst.msk [vmem:[#allocation2] sm:$0x1] %vm16_vm3, %v78_v46 }
 0x234   :  { %117 = shalt.err (!%p114_p4)
}
 0x235   :  { %89 = dma.vmem_to_hbm [thread:$0]  %s87_s13, 16, %s164_s2, [#allocation3]  }
 0x236   :  { %126 = dma.done.wait [#allocation3], 16  }
 0x237   :  { %127 = vsyncadd [#allocation3], 4294967280 }
 0x238   :  { %93 = vsyncpa [#allocation3], 1 }

</bundles_post_ra>
